<compile_context>
chip_gen: v5e
topology: v5e:2x2
jax: 0.10.0
libtpu: 0.0.40
codegen_flags: <defaults>
</compile_context>

<pallas_src>
import numpy as np
import jax
import jax.numpy as jnp
from jax.experimental import pallas as pl
from jax.experimental.pallas import tpu as pltpu


def _round_up(a: int, b: int) -> int:
    return (a + b - 1) // b * b


def _cdiv(a: int, b: int) -> int:
    return (a + b - 1) // b


def _vmem_capacity_bytes() -> int:
    try:
        info = pltpu.get_tpu_info()
        return int(getattr(info, "vmem_capacity_bytes", 64 << 20))
    except Exception:
        return 64 << 20  # conservative fallback (v7x per-TensorCore size)


def _mxu_rows() -> int:
    """Batch-tile cap: 128 on 128-wide-MXU chips, 256 on v6e/v7x."""
    try:
        kind = jax.devices()[0].device_kind.lower()
    except Exception:
        return 256
    if any(s in kind for s in ("v2", "v3", "v4", "v5 lite", "v5lite", "v5e", "v5p")):
        return 128
    return 256


# ---------------------------------------------------------------------------
# Kernel
# ---------------------------------------------------------------------------
def _fft_abs_kernel(e_ref, o_ref, basis_ref, out_ref, acc_re, acc_im):
    # e_ref:     (bm, tk)       even-symmetric fold of x
    # o_ref:     (bm, tk)       odd-symmetric fold of x
    # basis_ref: (tk, 2*fn)     [ cos cols for this freq tile | -sin cols ]
    # out_ref:   (bm, fn)       f32 magnitudes
    # acc_re/im: (bm, fn)       f32 VMEM accumulators (persist across k tiles)
    kk = pl.program_id(2)
    fn = out_ref.shape[-1]

    @pl.when(kk == 0)
    def _():
        acc_re[...] = jnp.zeros_like(acc_re)
        acc_im[...] = jnp.zeros_like(acc_im)

    cos_b = basis_ref[:, :fn]
    msin_b = basis_ref[:, fn:]
    acc_re[...] += jnp.dot(e_ref[...], cos_b, preferred_element_type=jnp.float32)
    acc_im[...] += jnp.dot(o_ref[...], msin_b, preferred_element_type=jnp.float32)

    @pl.when(kk == pl.num_programs(2) - 1)
    def _():
        re = acc_re[...]
        im = acc_im[...]
        out_ref[...] = jnp.sqrt(re * re + im * im)


# ---------------------------------------------------------------------------
# Host-side helpers (glue)
# ---------------------------------------------------------------------------
def _build_basis(T: int, F: int, Kf: int, K_pad: int, F_pad: int, fn: int) -> np.ndarray:
    """(K_pad, 2*F_pad) f32 basis over the FOLDED time axis, per-tile [cos|-sin]."""
    t = np.arange(Kf, dtype=np.int64)[:, None]        # (Kf, 1)
    k = np.arange(F, dtype=np.int64)[None, :]         # (1, F)
    # Exact integer (t*k) mod T avoids f32 rounding of t*k for large T.
    ang = (2.0 * np.pi / T) * ((t * k) % T).astype(np.float64)
    cos_m = np.cos(ang)                                # (Kf, F)
    msin_m = -np.sin(ang)                              # (Kf, F)

    nf = F_pad // fn
    basis = np.zeros((K_pad, 2 * F_pad), dtype=np.float32)
    for j in range(nf):
        lo = j * fn
        hi = min(F, lo + fn)
        if hi <= lo:
            continue                                   # fully padded tile
        w = hi - lo
        c0 = 2 * j * fn
        basis[:Kf, c0:c0 + w] = cos_m[:, lo:hi]
        basis[:Kf, c0 + fn:c0 + fn + w] = msin_m[:, lo:hi]
    return basis


def _fold_real(x: jax.Array, T: int, Kf: int):
    """Real-input symmetry fold: e[t]=x[t]+x[T-t], o[t]=x[t]-x[T-t], t=0..Kf-1."""
    idx = jnp.arange(Kf)
    rev = (T - idx) % T
    x_lo = x[:, :Kf]
    x_rev = jnp.take(x, rev, axis=1)
    e = x_lo + x_rev
    o = x_lo - x_rev
    self_paired = (idx == rev)[None, :]                # t=0 and (even T) t=T/2
    e = jnp.where(self_paired, x_lo, e)                # don't double-count
    return e, o                                        # o is already 0 there


def _select_tiles(Kf: int, F: int, ds: int, vmem_cap: int):
    """Choose (K_pad, tk, nk, F_pad, fn, nf).  ds = bytes per matmul operand."""
    F_pad0 = _round_up(F, 128)
    # Generation-aware per-buffer budget for the basis block.
    basis_budget = max(2 << 20, min(24 << 20, vmem_cap // 5))
    FN_CAP = 2048

    # First choice: whole folded time axis resident (single k tile).
    K_single = _round_up(Kf, 16)
    fn_single = (basis_budget // (K_single * 2 * ds)) // 128 * 128
    if fn_single >= min(F_pad0, 512):
        tk, nk, K_pad = K_single, 1, K_single
        fn = int(min(F_pad0, max(128, fn_single), FN_CAP))
    else:
        # Large T: tile the folded time axis as an innermost reduction axis.
        fn = int(min(F_pad0, 1024))
        tk_max = max(128, (basis_budget // (2 * fn * ds)) // 128 * 128)
        nk = _cdiv(Kf, tk_max)
        tk = _round_up(_cdiv(Kf, nk), 128)
        K_pad = nk * tk

    # Relax "fn divides F_pad" by padding F up instead of shrinking fn.
    nf = _cdiv(F_pad0, fn)
    F_pad = nf * fn
    return K_pad, tk, nk, F_pad, fn, nf


# ---------------------------------------------------------------------------
# Public wrapper:  abs(rfft(x, axis=-1))
# ---------------------------------------------------------------------------
def fft_abs(x: jax.Array, *, use_bf16: bool = True,
            batch_tile: int | None = None,
            freq_tile: int | None = None,
            k_tile: int | None = None) -> jax.Array:
    """abs(rfft(x)) for real x of shape (B, T).  Returns (B, T//2+1) float32."""
    B, T = x.shape
    F = T // 2 + 1
    Kf = F                                  # folded time length == T//2 + 1

    cdt = jnp.bfloat16 if use_bf16 else jnp.float32
    ds = 2 if use_bf16 else 4
    vmem_cap = _vmem_capacity_bytes()

    K_pad, tk, nk, F_pad, fn, nf = _select_tiles(Kf, F, ds, vmem_cap)
    if freq_tile is not None:               # test/override hooks
        fn = int(freq_tile)
        nf = _cdiv(_round_up(F, 128), fn)
        F_pad = nf * fn
    if k_tile is not None:
        tk = int(k_tile)
        nk = _cdiv(Kf, tk)
        K_pad = nk * tk

    # Batch tile: fill the MXU M dim (256 on v6e/v7x, 128 on older chips),
    # multiple of 16 for bf16 sublane packing.
    if batch_tile is None:
        bm = min(_mxu_rows(), _round_up(B, 16))
    else:
        bm = _round_up(int(batch_tile), 16)
    bm = max(16, bm)
    B_pad = _round_up(B, bm)
    nb = B_pad // bm

    # ---- host / XLA glue: fold, cast, pad, build basis -----------------------
    x = x.astype(jnp.float32)
    e, o = _fold_real(x, T, Kf)
    e = e.astype(cdt)
    o = o.astype(cdt)
    pad_b, pad_k = B_pad - B, K_pad - Kf
    if pad_b or pad_k:
        e = jnp.pad(e, ((0, pad_b), (0, pad_k)))
        o = jnp.pad(o, ((0, pad_b), (0, pad_k)))
    basis = jnp.asarray(_build_basis(T, F, Kf, K_pad, F_pad, fn)).astype(cdt)

    # ---- VMEM / cost bookkeeping ---------------------------------------------
    est = (2 * 2 * bm * tk * ds          # e + o blocks, double-buffered
           + 2 * tk * 2 * fn * ds        # basis block, double-buffered
           + 2 * bm * fn * 4             # output block, double-buffered
           + 2 * bm * fn * 4)            # two f32 accumulators
    vmem_limit = int(max(32 << 20, min(vmem_cap - (8 << 20), 100 << 20)))
    vmem_limit = max(vmem_limit, int(est * 1.25))

    cost = pl.CostEstimate(
        flops=int(4 * B_pad * K_pad * F_pad),
        transcendentals=0,
        bytes_accessed=int(ds * (2 * B_pad * K_pad * nf
                                 + K_pad * 2 * F_pad * (nb if nk > 1 else 1))
                           + 4 * B_pad * F_pad),
    )

    out = pl.pallas_call(
        _fft_abs_kernel,
        out_shape=jax.ShapeDtypeStruct((B_pad, F_pad), jnp.float32),
        grid_spec=pltpu.PrefetchScalarGridSpec(
            num_scalar_prefetch=0,
            # Freq tiles outer (megacore shards basis traffic), batch tiles
            # middle, folded-time reduction innermost ("arbitrary").
            grid=(nf, nb, nk),
            in_specs=[
                pl.BlockSpec((bm, tk), lambda jf, ib, kk: (ib, kk)),       # e
                pl.BlockSpec((bm, tk), lambda jf, ib, kk: (ib, kk)),       # o
                pl.BlockSpec((tk, 2 * fn), lambda jf, ib, kk: (kk, jf)),   # basis
            ],
            out_specs=pl.BlockSpec((bm, fn), lambda jf, ib, kk: (ib, jf)),
            scratch_shapes=[pltpu.VMEM((bm, fn), jnp.float32),
                            pltpu.VMEM((bm, fn), jnp.float32)],
        ),
        compiler_params=pltpu.CompilerParams(
            dimension_semantics=("parallel", "parallel", "arbitrary"),
            vmem_limit_bytes=vmem_limit,
        ),
        cost_estimate=cost,
    )(e, o, basis)

    return out[:B, :F]


# ---------------------------------------------------------------------------
# Self-test
# ---------------------------------------------------------------------------
def _check(B, T, key, *, use_bf16=True, **kw):
    x = jax.random.normal(key, (B, T), dtype=jnp.float32)
    out = np.asarray(jax.block_until_ready(fft_abs(x, use_bf16=use_bf16, **kw)))
    ref = np.abs(np.fft.rfft(np.asarray(x, dtype=np.float64), axis=-1)).astype(np.float32)
    assert out.shape == ref.shape, (out.shape, ref.shape)
    scale = float(np.sqrt(np.mean(ref ** 2)))     # typical |X[k]| magnitude
    if use_bf16:
        np.testing.assert_allclose(out, ref, rtol=1e-2, atol=2e-2 * scale)
    else:
        np.testing.assert_allclose(out, ref, rtol=2e-3, atol=3e-3 * scale)


if __name__ == "__main__":
    key = jax.random.PRNGKey(0)
    k1, k2, k3, k4 = jax.random.split(key, 4)

    # Small shapes consistent with the (B, T) forward.
    _check(16, 256, k1)                              # default bf16 fast path
    _check(16, 256, k1, use_bf16=False)              # exact f32 path
    _check(12, 200, k2)                              # non-multiple batch, even T
    _check(5, 129, k3)                               # odd T, tiny batch
    # Force multi-tile grid (freq tiles, k-reduction tiles, padded F/K).
    _check(8, 1024, k4, freq_tile=128, k_tile=128, batch_tile=16)

    print("KERNEL_OK")
</pallas_src>

<mosaic_0001>
module attributes {stable_mosaic.version = 11 : i64} {
  func.func @_fft_abs_kernel(%arg0: i32, %arg1: i32, %arg2: i32, %arg3: memref<16x144xbf16, #tpu.memory_space<vmem>>, %arg4: memref<16x144xbf16, #tpu.memory_space<vmem>>, %arg5: memref<144x512xbf16, #tpu.memory_space<vmem>>, %arg6: memref<16x256xf32, #tpu.memory_space<vmem>>, %arg7: memref<16x256xf32, #tpu.memory_space<vmem>>, %arg8: memref<16x256xf32, #tpu.memory_space<vmem>>) attributes {dimension_semantics = [#tpu.dimension_semantics<parallel>, #tpu.dimension_semantics<parallel>, #tpu.dimension_semantics<arbitrary>], iteration_bounds = array<i64: 1, 1, 1>, scalar_prefetch = 0 : i64, scratch_operands = 2 : i64, tpu.core_type = #tpu.core_type<tc>, window_params = [{transform_indices = @transform_0, window_bounds = array<i64: 16, 144>}, {transform_indices = @transform_1, window_bounds = array<i64: 16, 144>}, {transform_indices = @transform_2, window_bounds = array<i64: 144, 512>}, {transform_indices = @transform_3, window_bounds = array<i64: 16, 256>}]} {
    %c0_i32 = arith.constant 0 : i32
    %0 = arith.cmpi eq, %arg2, %c0_i32 : i32
    %1 = arith.extui %0 : i1 to i32
    %c0_i32_0 = arith.constant 0 : i32
    %2 = arith.cmpi ne, %1, %c0_i32_0 : i32
    scf.if %2 {
      %cst_18 = arith.constant 0.000000e+00 : f32
      %18 = vector.broadcast %cst_18 : f32 to vector<16x256xf32>
      %c0_19 = arith.constant 0 : index
      %c0_20 = arith.constant 0 : index
      %19 = vector.load %arg7[%c0_19, %c0_20] : memref<16x256xf32, #tpu.memory_space<vmem>>, vector<16x256xf32>
      tpu.vector_store %arg7[%c0_19, %c0_20], %18 {strides = array<i32>} : memref<16x256xf32, #tpu.memory_space<vmem>>, vector<16x256xf32>,
      %cst_21 = arith.constant 0.000000e+00 : f32
      %20 = vector.broadcast %cst_21 : f32 to vector<16x256xf32>
      %c0_22 = arith.constant 0 : index
      %c0_23 = arith.constant 0 : index
      %21 = vector.load %arg8[%c0_22, %c0_23] : memref<16x256xf32, #tpu.memory_space<vmem>>, vector<16x256xf32>
      tpu.vector_store %arg8[%c0_22, %c0_23], %20 {strides = array<i32>} : memref<16x256xf32, #tpu.memory_space<vmem>>, vector<16x256xf32>,
    } else {
    }
    %c0 = arith.constant 0 : index
    %c0_1 = arith.constant 0 : index
    %3 = vector.load %arg5[%c0, %c0_1] : memref<144x512xbf16, #tpu.memory_space<vmem>>, vector<144x256xbf16>
    %c0_2 = arith.constant 0 : index
    %c256 = arith.constant 256 : index
    %4 = vector.load %arg5[%c0_2, %c256] : memref<144x512xbf16, #tpu.memory_space<vmem>>, vector<144x256xbf16>
    %c0_3 = arith.constant 0 : index
    %c0_4 = arith.constant 0 : index
    %5 = vector.load %arg7[%c0_3, %c0_4] : memref<16x256xf32, #tpu.memory_space<vmem>>, vector<16x256xf32>
    %c0_5 = arith.constant 0 : index
    %c0_6 = arith.constant 0 : index
    %6 = vector.load %arg3[%c0_5, %c0_6] : memref<16x144xbf16, #tpu.memory_space<vmem>>, vector<16x144xbf16>
    %cst = arith.constant dense<0.000000e+00> : vector<16x256xf32>
    %7 = tpu.matmul %6, %3, %cst {dimension_numbers = #tpu.dot_dimension_numbers<[1], [0], [0], [1], [0, 0, 1, 1], [], []>} : vector<16x144xbf16>, vector<144x256xbf16>, vector<16x256xf32> -> vector<16x256xf32>
    %8 = arith.addf %5, %7 : vector<16x256xf32>
    %c0_7 = arith.constant 0 : index
    %c0_8 = arith.constant 0 : index
    %9 = vector.load %arg7[%c0_7, %c0_8] : memref<16x256xf32, #tpu.memory_space<vmem>>, vector<16x256xf32>
    tpu.vector_store %arg7[%c0_7, %c0_8], %8 {strides = array<i32>} : memref<16x256xf32, #tpu.memory_space<vmem>>, vector<16x256xf32>,
    %c0_9 = arith.constant 0 : index
    %c0_10 = arith.constant 0 : index
    %10 = vector.load %arg8[%c0_9, %c0_10] : memref<16x256xf32, #tpu.memory_space<vmem>>, vector<16x256xf32>
    %c0_11 = arith.constant 0 : index
    %c0_12 = arith.constant 0 : index
    %11 = vector.load %arg4[%c0_11, %c0_12] : memref<16x144xbf16, #tpu.memory_space<vmem>>, vector<16x144xbf16>
    %cst_13 = arith.constant dense<0.000000e+00> : vector<16x256xf32>
    %12 = tpu.matmul %11, %4, %cst_13 {dimension_numbers = #tpu.dot_dimension_numbers<[1], [0], [0], [1], [0, 0, 1, 1], [], []>} : vector<16x144xbf16>, vector<144x256xbf16>, vector<16x256xf32> -> vector<16x256xf32>
    %13 = arith.addf %10, %12 : vector<16x256xf32>
    %c0_14 = arith.constant 0 : index
    %c0_15 = arith.constant 0 : index
    %14 = vector.load %arg8[%c0_14, %c0_15] : memref<16x256xf32, #tpu.memory_space<vmem>>, vector<16x256xf32>
    tpu.vector_store %arg8[%c0_14, %c0_15], %13 {strides = array<i32>} : memref<16x256xf32, #tpu.memory_space<vmem>>, vector<16x256xf32>,
    %c0_i32_16 = arith.constant 0 : i32
    %15 = arith.cmpi eq, %arg2, %c0_i32_16 : i32
    %16 = arith.extui %15 : i1 to i32
    %c0_i32_17 = arith.constant 0 : i32
    %17 = arith.cmpi ne, %16, %c0_i32_17 : i32
    scf.if %17 {
      %c0_18 = arith.constant 0 : index
      %c0_19 = arith.constant 0 : index
      %18 = vector.load %arg7[%c0_18, %c0_19] : memref<16x256xf32, #tpu.memory_space<vmem>>, vector<16x256xf32>
      %c0_20 = arith.constant 0 : index
      %c0_21 = arith.constant 0 : index
      %19 = vector.load %arg8[%c0_20, %c0_21] : memref<16x256xf32, #tpu.memory_space<vmem>>, vector<16x256xf32>
      %20 = arith.mulf %18, %18 : vector<16x256xf32>
      %21 = arith.mulf %19, %19 : vector<16x256xf32>
      %22 = arith.addf %20, %21 : vector<16x256xf32>
      %23 = math.sqrt %22 : vector<16x256xf32>
      %c0_22 = arith.constant 0 : index
      %c0_23 = arith.constant 0 : index
      %24 = vector.load %arg6[%c0_22, %c0_23] : memref<16x256xf32, #tpu.memory_space<vmem>>, vector<16x256xf32>
      tpu.vector_store %arg6[%c0_22, %c0_23], %23 {strides = array<i32>} : memref<16x256xf32, #tpu.memory_space<vmem>>, vector<16x256xf32>,
    } else {
    }
    return
  }
  func.func @transform_0(%arg0: i32, %arg1: i32, %arg2: i32) -> (i32, i32) {
    %c0_i32 = arith.constant 0 : i32
    return %arg1, %arg2 : i32, i32
  }
  func.func @transform_1(%arg0: i32, %arg1: i32, %arg2: i32) -> (i32, i32) {
    %c0_i32 = arith.constant 0 : i32
    return %arg1, %arg2 : i32, i32
  }
  func.func @transform_2(%arg0: i32, %arg1: i32, %arg2: i32) -> (i32, i32) {
    %c0_i32 = arith.constant 0 : i32
    return %arg2, %arg0 : i32, i32
  }
  func.func @transform_3(%arg0: i32, %arg1: i32, %arg2: i32) -> (i32, i32) {
    %c0_i32 = arith.constant 0 : i32
    return %arg1, %arg0 : i32, i32
  }
}

</mosaic_0001>

<bundles_post_ra>
// kernel: tpu_custom_call.1
= control target key start
LH: loop header
LB: loop body
LE: loop exit
PB: predicated region body
PF: predicated region fallthrough
CT: control target
= control target key end

     0   :  { %8 = vsyncpa [#allocation5], 0  ;;  %s931_s0 = inlined_call_operand.hbm [shape: bf16[16,144], index: 0, kind: input, shape index: {}]   ;;  %s932_s1 = inlined_call_operand.hbm [shape: bf16[16,144], index: 1, kind: input, shape index: {}]   ;;  %s933_s2 = inlined_call_operand.hbm [shape: bf16[144,512], index: 2, kind: input, shape index: {}]   ;;  %s934_s3 = inlined_call_operand.hbm [shape: f32[16,256], index: 3, kind: output, shape index: {}]  }
   0x1   :  { %9 = vsyncpa [#allocation8], 0 }
   0x2   :  { %10 = vsyncpa [#allocation6], 0  ;;  %s28_s14 = sshll.u32 %s932_s1, 4  ;;  %s873_s15 = smov [#allocation7]   ;;  %s29_s14 = int_to_ptr.hbm [resolvable:$true] %s28_s14 }
   0x3   :  { %s30_s16 = sshll.u32 %s873_s15, 4  ;;  %s15_s19 = sshll.u32 %s931_s0, 4  ;;  %s31_s16 = int_to_ptr.vmem [resolvable:$true] %s30_s16  ;;  %s16_s19 = int_to_ptr.hbm [resolvable:$true] %s15_s19 }
   0x4   :  { %s874_s20 = smov 128   ;;  %s875_s21 = smov 8  }
   0x5   :  { %36 = dma.hbm_to_vmem [thread:$0]  %s29_s14, 256, %s31_s16, [#allocation8], %s874_s20, %s874_s20, %s875_s21  }
   0x6   :  { %s876_s22 = smov [#allocation4]   ;;  %s41_s26 = sshll.u32 %s933_s2, 4  ;;  %s42_s26 = int_to_ptr.hbm [resolvable:$true] %s41_s26 }
   0x7   :  { %s17_s23 = sshll.u32 %s876_s22, 4  ;;  %s877_s1 = smov [#allocation9]   ;;  %s18_s23 = int_to_ptr.vmem [resolvable:$true] %s17_s23 }
   0x8   :  { %23 = dma.hbm_to_vmem [thread:$0]  %s16_s19, 256, %s18_s23, [#allocation5], %s874_s20, %s874_s20, %s875_s21  }
   0x9   :  { %s43_s27 = sshll.u32 %s877_s1, 4  ;;  %s878_s28 = smov 256   ;;  %s44_s27 = int_to_ptr.vmem [resolvable:$true] %s43_s27 }
   0xa   :  { %s879_s29 = smov 16  }
   0xb   :  { %49 = dma.hbm_to_vmem [thread:$0]  %s42_s26, 4608, %s44_s27, [#allocation8], %s878_s28, %s878_s28, %s879_s29  }
   0xc   :  { %867 = dma.done.wait [#allocation5], 256  }
   0xd   :  { %868 = vsyncadd [#allocation5], 4294967040 }
   0xe   :  { %869 = dma.done.wait [#allocation8], 4864  }
   0xf   :  { %870 = vsyncadd [#allocation8], 4294962432  ;;  %v617_v0 = vld [vmem:[#allocation9 + $0xe0] sm:$0xf]  ;;  %v730_v1 = vld [vmem:[#allocation9 + $0xec] sm:$0xf0] }
  0x10   :  { %v625_v2 = vld [vmem:[#allocation9 + $0x100] sm:$0xf]  ;;  %v618_v3 = vor.u32 %v730_v1, %v617_v0  ;;  %v732_v4 = vld [vmem:[#allocation9 + $0x10c] sm:$0xf0]  ;;  %v729_v5 = vld [vmem:[#allocation9 + $0xe4] sm:$0xf] }
  0x11   :  { %v619_v6 = vld [vmem:[#allocation9 + $0xf0] sm:$0xf0]  ;;  %v626_v7 = vor.u32 %v732_v4, %v625_v2  ;;  %v699_v9 = vld [vmem:[#allocation9 + $0xe8] sm:$0xf]  ;;  %v748_v10 = vld [vmem:[#allocation9 + $0xf4] sm:$0xf0] }
  0x12   :  { %v622_v8 = vor.u32 %v729_v5, %v619_v6  ;;  %v609_v11 = vld [vmem:[#allocation9 + $0xc0] sm:$0xf]  ;;  %220 = vmatpush.bf16.msra.mxu0 %v618_v3  ;;  %v700_v12 = vor.u32 %v748_v10, %v699_v9  ;;  %v728_v13 = vld [vmem:[#allocation9 + $0xcc] sm:$0xf0]  ;;  %v727_v14 = vld [vmem:[#allocation9 + $0xc4] sm:$0xf] }
  0x13   :  { %v611_v15 = vld [vmem:[#allocation9 + $0xd0] sm:$0xf0]  ;;  %241 = vmatpush.bf16.msra.mxu1 %v626_v7  ;;  %v610_v16 = vor.u32 %v728_v13, %v609_v11  ;;  %v691_v18 = vld [vmem:[#allocation9 + $0xc8] sm:$0xf]  ;;  %v746_v19 = vld [vmem:[#allocation9 + $0xd4] sm:$0xf0] }
  0x14   :  { %248 = vmatpush.bf16.msra.mxu2 %v622_v8  ;;  %v614_v17 = vor.u32 %v727_v14, %v611_v15  ;;  %v707_v20 = vld [vmem:[#allocation9 + $0x108] sm:$0xf]  ;;  %v692_v21 = vor.u32 %v746_v19, %v691_v18  ;;  %v750_v22 = vld [vmem:[#allocation9 + $0x114] sm:$0xf0]  ;;  %v601_v23 = vld [vmem:[#allocation9 + $0xa0] sm:$0xf] }
  0x15   :  { %v726_v24 = vld [vmem:[#allocation9 + $0xac] sm:$0xf0]  ;;  %v708_v25 = vor.u32 %v750_v22, %v707_v20  ;;  %v725_v26 = vld [vmem:[#allocation9 + $0xa4] sm:$0xf]  ;;  %v603_v27 = vld [vmem:[#allocation9 + $0xb0] sm:$0xf0] }
  0x16   :  { %v747_v28 = vld [vmem:[#allocation9 + $0xec] sm:$0xf]  ;;  %221 = vmatpush.bf16.msra.mxu0 %v610_v16  ;;  %v602_v29 = vor.u32 %v726_v24, %v601_v23  ;;  %v701_v30 = vld [vmem:[#allocation9 + $0xf8] sm:$0xf0]  ;;  %v683_v31 = vld [vmem:[#allocation9 + $0xa8] sm:$0xf]  ;;  %v606_v33 = vor.u32 %v725_v26, %v603_v27 }
  0x17   :  { %392 = vmatpush.bf16.msrb.mxu1 %v700_v12  ;;  %v744_v32 = vld [vmem:[#allocation9 + $0xb4] sm:$0xf0]  ;;  %413 = vmatpush.bf16.msra.mxu3 %v708_v25  ;;  %v704_v34 = vor.u32 %v747_v28, %v701_v30  ;;  %v593_v35 = vld [vmem:[#allocation9 + $0x80] sm:$0xf]  ;;  %v724_v36 = vld [vmem:[#allocation9 + $0x8c] sm:$0xf0] }
  0x18   :  { %249 = vmatpush.bf16.msra.mxu2 %v614_v17  ;;  %v723_v37 = vld [vmem:[#allocation9 + $0x84] sm:$0xf]  ;;  %v684_v38 = vor.u32 %v744_v32, %v683_v31  ;;  %v595_v39 = vld [vmem:[#allocation9 + $0x90] sm:$0xf0]  ;;  %v745_v40 = vld [vmem:[#allocation9 + $0xcc] sm:$0xf]  ;;  %v594_v45 = vor.u32 %v724_v36, %v593_v35 }
  0x19   :  { %v693_v41 = vld [vmem:[#allocation9 + $0xd8] sm:$0xf0]  ;;  %v675_v43 = vld [vmem:[#allocation9 + $0x88] sm:$0xf]  ;;  %v742_v44 = vld [vmem:[#allocation9 + $0x94] sm:$0xf0]  ;;  %v598_v48 = vor.u32 %v723_v37, %v595_v39 }
  0x1a   :  { %v696_v42 = vor.u32 %v745_v40, %v693_v41  ;;  %222 = vmatpush.bf16.msra.mxu0 %v602_v29  ;;  %v751_v46 = vld [vmem:[#allocation4 + $0x4] sm:$0xf]  ;;  %v555_v47 = vld [vmem:[#allocation4 + $0x8] sm:$0xf0]  ;;  %vm216_vm0 = vcmask 130048   ;;  %v676_v53 = vor.u32 %v742_v44, %v675_v43  ;;  %s880_s0 = smov [#allocation10]  }
  0x1b   :  { %393 = vmatpush.bf16.msrb.mxu1 %v692_v21  ;;  %420 = vmatpush.bf16.msrb.mxu3 %v704_v34  ;;  %v585_v49 = vld [vmem:[#allocation9 + $0x60] sm:$0xf]  ;;  %v722_v50 = vld [vmem:[#allocation9 + $0x6c] sm:$0xf0]  ;;  %v913_v51 = vor.u32 %v751_v46, %v555_v47  ;;  %v743_v52 = vld [vmem:[#allocation9 + $0xac] sm:$0xf] }
  0x1c   :  { %250 = vmatpush.bf16.msra.mxu2 %v606_v33  ;;  %v721_v54 = vld [vmem:[#allocation9 + $0x64] sm:$0xf]  ;;  %v587_v55 = vld [vmem:[#allocation9 + $0x70] sm:$0xf0]  ;;  %v685_v56 = vld [vmem:[#allocation9 + $0xb8] sm:$0xf0]  ;;  %v586_v60 = vor.u32 %v722_v50, %v585_v49 }
  0x1d   :  { %631 = vmatmul.msk.bf16.vlgmr.msra.gmra.mxu1 %vm216_vm0, %v913_v51  ;;  %v688_v57 = vor.u32 %v743_v52, %v685_v56  ;;  %v667_v58 = vld [vmem:[#allocation9 + $0x68] sm:$0xf]  ;;  %v740_v59 = vld [vmem:[#allocation9 + $0x74] sm:$0xf0]  ;;  %v741_v61 = vld [vmem:[#allocation9 + $0x8c] sm:$0xf]  ;;  %v590_v63 = vor.u32 %v721_v54, %v587_v55 }
  0x1e   :  { %223 = vmatpush.bf16.msra.mxu0 %v594_v45  ;;  %v677_v62 = vld [vmem:[#allocation9 + $0x98] sm:$0xf0]  ;;  %v577_v0 = vld [vmem:[#allocation9 + $0x40] sm:$0xf]  ;;  %v720_v1 = vld [vmem:[#allocation9 + $0x4c] sm:$0xf0]  ;;  %v668_v3 = vor.u32 %v740_v59, %v667_v58 }
  0x1f   :  { %394 = vmatpush.bf16.msrb.mxu1 %v684_v38  ;;  %421 = vmatpush.bf16.msrb.mxu3 %v696_v42  ;;  %v753_v2 = vld [vmem:[#allocation7 + $0x4] sm:$0xf]  ;;  %v719_v4 = vld [vmem:[#allocation9 + $0x44] sm:$0xf]  ;;  %v637_v6 = vld [vmem:[#allocation7 + $0x8] sm:$0xf0]  ;;  %v680_v7 = vor.u32 %v741_v61, %v677_v62  ;;  %v578_v11 = vor.u32 %v720_v1, %v577_v0 }
  0x20   :  { %251 = vmatpush.bf16.msra.mxu2 %v598_v48  ;;  %v579_v5 = vld [vmem:[#allocation9 + $0x50] sm:$0xf0]  ;;  %v659_v8 = vld [vmem:[#allocation9 + $0x48] sm:$0xf]  ;;  %v738_v9 = vld [vmem:[#allocation9 + $0x54] sm:$0xf0]  ;;  %v917_v10 = vor.u32 %v753_v2, %v637_v6 }
  0x21   :  { %v739_v12 = vld [vmem:[#allocation9 + $0x6c] sm:$0xf]  ;;  %v669_v13 = vld [vmem:[#allocation9 + $0x78] sm:$0xf0]  ;;  %v582_v14 = vor.u32 %v719_v4, %v579_v5  ;;  %v569_v15 = vld [vmem:[#allocation9 + $0x20] sm:$0xf]  ;;  %v660_v17 = vor.u32 %v738_v9, %v659_v8 }
  0x22   :  { %224 = vmatpush.bf16.msra.mxu0 %v586_v60  ;;  %713 = vmatmul.msk.bf16.vlgmr.msra.gmra.mxu3 %vm216_vm0, %v917_v10  ;;  %v718_v16 = vld [vmem:[#allocation9 + $0x2c] sm:$0xf0]  ;;  %v717_v18 = vld [vmem:[#allocation9 + $0x24] sm:$0xf]  ;;  %v571_v19 = vld [vmem:[#allocation9 + $0x30] sm:$0xf0]  ;;  %v672_v20 = vor.u32 %v739_v12, %v669_v13 }
  0x23   :  { %395 = vmatpush.bf16.msrb.mxu1 %v676_v53  ;;  %422 = vmatpush.bf16.msrb.mxu3 %v688_v57  ;;  %v651_v21 = vld [vmem:[#allocation9 + $0x28] sm:$0xf]  ;;  %v736_v22 = vld [vmem:[#allocation9 + $0x34] sm:$0xf0]  ;;  %v561_v23 = vld [vmem:[#allocation9] sm:$0xf]  ;;  %v570_v24 = vor.u32 %v718_v16, %v569_v15  ;;  %v574_v28 = vor.u32 %v717_v18, %v571_v19 }
  0x24   :  { %252 = vmatpush.bf16.msra.mxu2 %v590_v63  ;;  %v716_v25 = vld [vmem:[#allocation9 + $0xc] sm:$0xf0]  ;;  %v737_v26 = vld [vmem:[#allocation9 + $0x4c] sm:$0xf]  ;;  %v661_v27 = vld [vmem:[#allocation9 + $0x58] sm:$0xf0]  ;;  %v652_v32 = vor.u32 %v736_v22, %v651_v21 }
  0x25   :  { %v715_v29 = vld [vmem:[#allocation9 + $0x4] sm:$0xf]  ;;  %v563_v30 = vld [vmem:[#allocation9 + $0x10] sm:$0xf0]  ;;  %v643_v31 = vld [vmem:[#allocation9 + $0x8] sm:$0xf]  ;;  %v664_v36 = vor.u32 %v737_v26, %v661_v27  ;;  %v562_v40 = vor.u32 %v716_v25, %v561_v23 }
  0x26   :  { %225 = vmatpush.bf16.msra.mxu0 %v578_v11  ;;  %v734_v33 = vld [vmem:[#allocation9 + $0x14] sm:$0xf0]  ;;  %v553_v34 = vld [vmem:[#allocation4] sm:$0xf]  ;;  %v731_v35 = vld [vmem:[#allocation9 + $0x104] sm:$0xf]  ;;  %v566_v44 = vor.u32 %v715_v29, %v563_v30 }
  0x27   :  { %396 = vmatpush.bf16.msrb.mxu1 %v668_v3  ;;  %423 = vmatpush.bf16.msrb.mxu3 %v680_v7  ;;  %v627_v37 = vld [vmem:[#allocation9 + $0x110] sm:$0xf0]  ;;  %v749_v38 = vld [vmem:[#allocation9 + $0x10c] sm:$0xf]  ;;  %v709_v39 = vld [vmem:[#allocation9 + $0x118] sm:$0xf0]  ;;  %v644_v46 = vor.u32 %v734_v33, %v643_v31 }
  0x28   :  { %253 = vmatpush.bf16.msra.mxu2 %v582_v14  ;;  %v752_v41 = vld [vmem:[#allocation4 + $0x4] sm:$0xf0]  ;;  %v735_v42 = vld [vmem:[#allocation9 + $0x2c] sm:$0xf]  ;;  %v653_v43 = vld [vmem:[#allocation9 + $0x38] sm:$0xf0]  ;;  %v712_v45 = vor.u32 %v749_v38, %v709_v39  ;;  %v630_v47 = vor.u32 %v731_v35, %v627_v37 }
  0x29   :  { %v635_v48 = vld [vmem:[#allocation7] sm:$0xf]  ;;  %v754_v49 = vld [vmem:[#allocation7 + $0x4] sm:$0xf0]  ;;  %v554_v50 = vor.u32 %v752_v41, %v553_v34  ;;  %v656_v52 = vor.u32 %v735_v42, %v653_v43  ;;  %v733_v53 = vld [vmem:[#allocation9 + $0xc] sm:$0xf] }
  0x2a   :  { %226 = vmatpush.bf16.msra.mxu0 %v570_v24  ;;  %v645_v54 = vld [vmem:[#allocation9 + $0x18] sm:$0xf0]  ;;  %v636_v55 = vor.u32 %v754_v49, %v635_v48  ;;  %s535_s2 = sshll.u32 %s880_s0, 4  ;;  %s537_s5 = sshll.u32 %s934_s3, 4  ;;  %s536_s2 = int_to_ptr.vmem [resolvable:$true] %s535_s2  ;;  %s538_s5 = int_to_ptr.hbm [resolvable:$true] %s537_s5 }
  0x2b   :  { %397 = vmatpush.bf16.msrb.mxu1 %v660_v17  ;;  %424 = vmatpush.bf16.msrb.mxu3 %v672_v20  ;;  %v648_v56 = vor.u32 %v733_v53, %v645_v54 }
  0x2c   :  { %254 = vmatpush.bf16.msra.mxu2 %v574_v28 }
  0x2e   :  { %227 = vmatpush.bf16.msra.mxu0 %v562_v40 }
  0x2f   :  { %398 = vmatpush.bf16.msrb.mxu1 %v652_v32  ;;  %425 = vmatpush.bf16.msrb.mxu3 %v664_v36 }
  0x30   :  { %255 = vmatpush.bf16.msra.mxu2 %v566_v44 }
  0x31   :  { %228 = vmatmul.bf16.vlgmr.msra.gmra.mxu0 %v554_v50 }
  0x32   :  { %441 = vmatpush.bf16.msrb.mxu0 %v712_v45 }
  0x33   :  { %399 = vmatpush.bf16.msrb.mxu1 %v644_v46  ;;  %426 = vmatpush.bf16.msrb.mxu3 %v656_v52 }
  0x34   :  { %269 = vmatpush.bf16.msrb.mxu2 %v630_v47 }
  0x35   :  { %256 = vmatmul.bf16.vlgmr.msra.gmra.mxu2 %v554_v50 }
  0x36   :  { %400 = vmatmul.bf16.vlgmr.msrb.gmra.mxu1 %v636_v55 }
  0x37   :  { %427 = vmatpush.bf16.msrb.mxu3 %v648_v56 }
  0x3a   :  { %428 = vmatmul.bf16.vlgmr.msrb.gmra.mxu3 %v636_v55 }
  0x41   :  { %714 = vmatmul.msk.bf16.vlgmr.msrb.gmra.mxu0 %vm216_vm0, %v917_v10 }
  0x45   :  { %632 = vmatmul.msk.bf16.vlgmr.msrb.gmra.mxu2 %vm216_vm0, %v913_v51 }
  0x9a   :  { %v243_v57 = vpop.f32.mrf.mxu1 }
  0xa2   :  { %v245_v58 = vpop.f32.mrf.mxu1 }
  0xa5   :  { %v415_v59 = vpop.f32.mrf.mxu3 }
  0xad   :  { %v417_v5 = vpop.f32.mrf.mxu3 }
  0xae   :  { %v229_v60 = vpop.f32.mrf.mxu0 }
  0xaf   :  { %v244_v61 = vadd.f32 %v243_v57, %v229_v60 }
  0xb1   :  { %v467_v63 = vmul.f32 %v244_v61, %v244_v61 }
  0xb3   :  { %v401_v62 = vpop.f32.mrf.mxu1 }
  0xb4   :  { %v416_v0 = vadd.f32 %v415_v59, %v401_v62 }
  0xb6   :  { %v471_v1 = vmul.f32 %v416_v0, %v416_v0  ;;  %v231_v4 = vpop.f32.mrf.mxu0 }
  0xb7   :  { %v246_v6 = vadd.f32 %v245_v58, %v231_v4 }
  0xb8   :  { %v475_v2 = vadd.f32 %v471_v1, %v467_v63  ;;  %v257_v3 = vpop.f32.mrf.mxu2 }
  0xb9   :  { %v469_v8 = vmul.f32 %v246_v6, %v246_v6 }
  0xba   :  { %763 = vrsqrt.f32 %v475_v2  ;;  %vm486_vm1 = vcmp.eq.f32.partialorder %v475_v2, inf  ;;  %v489_v30 = vand.u32 2147483648, %v475_v2  ;;  %vm488_vm2 = vcmp.eq.f32.partialorder %v475_v2, 0.0 }
  0xbb   :  { %v403_v7 = vpop.f32.mrf.mxu1 }
  0xbc   :  { %v418_v9 = vadd.f32 %v417_v5, %v403_v7 }
  0xbd   :  { %v429_v16 = vpop.f32.mrf.mxu3 }
  0xbe   :  { %v473_v10 = vmul.f32 %v418_v9, %v418_v9  ;;  %v443_v14 = vpop.f32.mrf.mxu0 }
  0xbf   :  { %v444_v17 = vadd.f32 %v443_v14, %v429_v16 }
  0xc0   :  { %v764_v51 = vpop.eup %763  ;;  %v477_v11 = vadd.f32 %v473_v10, %v469_v8  ;;  %v259_v12 = vpop.f32.mrf.mxu2 }
  0xc1   :  { %v480_v13 = vmul.f32 %v764_v51, %v475_v2  ;;  %v472_v22 = vmul.f32 %v444_v17, %v444_v17 }
  0xc2   :  { %765 = vrsqrt.f32 %v477_v11  ;;  %vm510_vm3 = vcmp.eq.f32.partialorder %v477_v11, inf  ;;  %v513_v46 = vand.u32 2147483648, %v477_v11  ;;  %vm512_vm4 = vcmp.eq.f32.partialorder %v477_v11, 0.0 }
  0xc3   :  { %v481_v15 = vmul.f32 %v764_v51, %v480_v13 }
  0xc5   :  { %v482_v18 = vmul.f32 0.5, %v481_v15  ;;  %v431_v34 = vpop.f32.mrf.mxu3 }
  0xc6   :  { %v445_v29 = vpop.f32.mrf.mxu0 }
  0xc7   :  { %v483_v19 = vsub.f32 1.5, %v482_v18  ;;  %v446_v36 = vadd.f32 %v445_v29, %v431_v34 }
  0xc8   :  { %v766_v20 = vpop.eup %765  ;;  %v271_v21 = vpop.f32.mrf.mxu2 }
  0xc9   :  { %v272_v23 = vadd.f32 %v271_v21, %v257_v3  ;;  %v484_v24 = vmul.f32 %v764_v51, %v483_v19  ;;  %v504_v25 = vmul.f32 %v766_v20, %v477_v11  ;;  %v474_v41 = vmul.f32 %v446_v36, %v446_v36 }
  0xcb   :  { %v468_v26 = vmul.f32 %v272_v23, %v272_v23  ;;  %v485_v27 = vmul.f32 %v484_v24, %v475_v2  ;;  %v505_v28 = vmul.f32 %v766_v20, %v504_v25 }
  0xcd   :  { %v476_v31 = vadd.f32 %v472_v22, %v468_v26  ;;  %v487_v32 = vsel %vm486_vm1, %v475_v2, %v485_v27  ;;  %v506_v33 = vmul.f32 0.5, %v505_v28 }
  0xce   :  { %v490_v35 = vsel %vm488_vm2, %v489_v30, %v487_v32 }
  0xcf   :  { %767 = vrsqrt.f32 %v476_v31  ;;  %527 = vst [vmem:[#allocation10] sm:$0xff] %v490_v35  ;;  %v507_v38 = vsub.f32 1.5, %v506_v33  ;;  %vm498_vm5 = vcmp.eq.f32.partialorder %v476_v31, inf  ;;  %v501_v59 = vand.u32 2147483648, %v476_v31 }
  0xd0   :  { %v273_v37 = vpop.f32.mrf.mxu2  ;;  %vm500_vm6 = vcmp.eq.f32.partialorder %v476_v31, 0.0 }
  0xd1   :  { %v274_v39 = vadd.f32 %v273_v37, %v259_v12  ;;  %v508_v40 = vmul.f32 %v766_v20, %v507_v38 }
  0xd3   :  { %v470_v42 = vmul.f32 %v274_v39, %v274_v39  ;;  %v509_v43 = vmul.f32 %v508_v40, %v477_v11 }
  0xd5   :  { %v768_v44 = vpop.eup %767  ;;  %v478_v45 = vadd.f32 %v474_v41, %v470_v42  ;;  %v511_v48 = vsel %vm510_vm3, %v477_v11, %v509_v43 }
  0xd6   :  { %v492_v47 = vmul.f32 %v768_v44, %v476_v31  ;;  %v514_v49 = vsel %vm512_vm4, %v513_v46, %v511_v48 }
  0xd7   :  { %769 = vrsqrt.f32 %v478_v45  ;;  %529 = vst [vmem:[#allocation10 + $0x10] sm:$0xff] %v514_v49  ;;  %vm522_vm7 = vcmp.eq.f32.partialorder %v478_v45, inf  ;;  %v525_v2 = vand.u32 2147483648, %v478_v45  ;;  %vm524_vm8 = vcmp.eq.f32.partialorder %v478_v45, 0.0 }
  0xd8   :  { %v493_v50 = vmul.f32 %v768_v44, %v492_v47 }
  0xda   :  { %v494_v52 = vmul.f32 0.5, %v493_v50 }
  0xdc   :  { %v495_v53 = vsub.f32 1.5, %v494_v52 }
  0xdd   :  { %v770_v54 = vpop.eup %769 }
  0xde   :  { %v496_v55 = vmul.f32 %v768_v44, %v495_v53  ;;  %v516_v56 = vmul.f32 %v770_v54, %v478_v45 }
  0xe0   :  { %v497_v57 = vmul.f32 %v496_v55, %v476_v31  ;;  %v517_v58 = vmul.f32 %v770_v54, %v516_v56 }
  0xe2   :  { %v499_v60 = vsel %vm498_vm5, %v476_v31, %v497_v57  ;;  %v518_v61 = vmul.f32 0.5, %v517_v58 }
  0xe3   :  { %v502_v62 = vsel %vm500_vm6, %v501_v59, %v499_v60 }
  0xe4   :  { %v519_v63 = vsub.f32 1.5, %v518_v61  ;;  %528 = vst [vmem:[#allocation10 + $0x8] sm:$0xff] %v502_v62 }
  0xe6   :  { %v520_v0 = vmul.f32 %v770_v54, %v519_v63 }
  0xe8   :  { %v521_v1 = vmul.f32 %v520_v0, %v478_v45 }
  0xea   :  { %v523_v3 = vsel %vm522_vm7, %v478_v45, %v521_v1 }
  0xeb   :  { %v526_v4 = vsel %vm524_vm8, %v525_v2, %v523_v3 }
  0xec   :  { %530 = vst [vmem:[#allocation10 + $0x18] sm:$0xff] %v526_v4 }
  0xed   :  { %543 = dma.vmem_to_hbm [thread:$0]  %s536_s2, 512, %s538_s5, [#allocation6], %s878_s28, %s878_s28, %s879_s29  }
  0xee   :  { %871 = dma.done.wait [#allocation6], 512  }
  0xef   :  { %872 = vsyncadd [#allocation6], 4294966784 }
  0xf0   :  { %548 = vsyncpa [#allocation5], 1 }
  0xf1   :  { %549 = vsyncpa [#allocation8], 1 }
  0xf2   :  { %550 = vsyncpa [#allocation6], 1 }

</bundles_post_ra>
